<compile_context>
chip_gen: v7x
topology: tpu7x:2x2x1
jax: 0.10.0
libtpu: 0.0.40
codegen_flags: <defaults>
</compile_context>

<pallas_src>
import functools
import math

import numpy as np
import jax
import jax.numpy as jnp
from jax import lax
from jax.experimental import pallas as pl
from jax.experimental.pallas import tpu as pltpu

# ----------------------------------------------------------------------------
# Chip-aware configuration
# ----------------------------------------------------------------------------
def _device_kind():
    try:
        return jax.devices()[0].device_kind.lower()
    except Exception:
        return ""


_KIND = _device_kind()
_MULTI_TC = ("v7" in _KIND) or ("tpu7" in _KIND)        # v7x: 2 TensorCores/chip
if _MULTI_TC:
    _VMEM_LIMIT = 48 * 1024 * 1024                      # 64 MiB physical on v7x
elif ("v5" in _KIND) or ("v6" in _KIND):
    _VMEM_LIMIT = 96 * 1024 * 1024                      # 128 MiB physical parts
else:
    _VMEM_LIMIT = 32 * 1024 * 1024

_BM_CAP, _BK_CAP, _BN_CAP = 256, 4608, 256


def _round_up(x, m):
    return (x + m - 1) // m * m


def _split_dim(size, align, cap):
    """Pad `size` to `align` and pick a tile <= cap with minimal padding."""
    p0 = _round_up(size, align)
    if p0 <= cap:
        return p0, p0
    n = -(-p0 // cap)
    t = _round_up(-(-p0 // n), align)
    return n * t, t


# ----------------------------------------------------------------------------
# Pallas fused matmul kernels:  O = relu( (A @ B [+ R]) * scale + bias [+ R] )
# ----------------------------------------------------------------------------
def _mm_kernel_single(a_ref, b_ref, s_ref, c_ref, *rest, do_relu, has_res, res_first):
    # Single K-step: no accumulator scratch, no init/finalize predication.
    if has_res:
        r_ref, o_ref = rest
    else:
        (o_ref,) = rest
    acc = jnp.dot(a_ref[...], b_ref[...], preferred_element_type=jnp.float32)
    if has_res and res_first:
        acc = acc + r_ref[...].astype(jnp.float32)
    y = acc * s_ref[...] + c_ref[...]
    if has_res and not res_first:
        y = y + r_ref[...].astype(jnp.float32)
    if do_relu:
        y = jnp.maximum(y, 0.0)
    o_ref[...] = y.astype(o_ref.dtype)


def _mm_kernel_multi(a_ref, b_ref, s_ref, c_ref, *rest, do_relu, has_res, res_first):
    if has_res:
        r_ref, o_ref, acc_ref = rest
    else:
        o_ref, acc_ref = rest

    @pl.when(pl.program_id(2) == 0)
    def _():
        acc_ref[...] = jnp.zeros_like(acc_ref)

    acc_ref[...] += jnp.dot(a_ref[...], b_ref[...],
                            preferred_element_type=jnp.float32)

    @pl.when(pl.program_id(2) == pl.num_programs(2) - 1)
    def _():
        acc = acc_ref[...]
        if has_res and res_first:
            acc = acc + r_ref[...].astype(jnp.float32)
        y = acc * s_ref[...] + c_ref[...]
        if has_res and not res_first:
            y = y + r_ref[...].astype(jnp.float32)
        if do_relu:
            y = jnp.maximum(y, 0.0)
        o_ref[...] = y.astype(o_ref.dtype)


def matmul_prepped(a, pw, *, relu=False, residual=None, res_before_scale=False,
                   out_dtype=jnp.bfloat16):
    """a: [M,K]; pw: prepared weight dict (see prep_matmul) -> [M, N] out_dtype."""
    M, K = a.shape
    N = pw['N']
    a = a.astype(jnp.bfloat16)

    if pw['fallback']:
        # Tiny outputs (e.g. Cout=2 delta convs): plain XLA dot, same epilogue.
        acc = jnp.dot(a, pw['B'], preferred_element_type=jnp.float32)
        if residual is not None and res_before_scale:
            acc = acc + residual.astype(jnp.float32)
        y = acc * pw['scale'] + pw['bias']
        if residual is not None and not res_before_scale:
            y = y + residual.astype(jnp.float32)
        if relu:
            y = jnp.maximum(y, 0.0)
        return y.astype(out_dtype)

    Kp, bk, Np, bn = pw['Kp'], pw['bk'], pw['Np'], pw['bn']
    Mp, bm = _split_dim(M, 16, _BM_CAP)

    # v7x only: keep both TensorCores busy by making the parallel block count even.
    if _MULTI_TC and ((Mp // bm) * (Np // bn)) % 2 == 1:
        if bn >= 256:
            bn //= 2
        elif bm >= 32 and (bm // 2) % 16 == 0:
            bm //= 2

    a_p = a if (Mp == M and Kp == K) else jnp.pad(a, ((0, Mp - M), (0, Kp - K)))
    inputs = [a_p, pw['B'], pw['scale'], pw['bias']]
    has_res = residual is not None
    if has_res:
        r = residual.astype(jnp.bfloat16)
        r_p = r if (Mp == M and Np == N) else jnp.pad(r, ((0, Mp - M), (0, Np - N)))
        inputs.append(r_p)

    single_k = (Kp == bk)
    cparams = pltpu.CompilerParams(
        dimension_semantics=("parallel", "parallel") if single_k
        else ("parallel", "parallel", "arbitrary"),
        vmem_limit_bytes=_VMEM_LIMIT,
    )

    if single_k:
        in_specs = [
            pl.BlockSpec((bm, bk), lambda i, j: (i, 0)),
            pl.BlockSpec((bk, bn), lambda i, j: (0, j)),
            pl.BlockSpec((1, bn), lambda i, j: (0, j)),
            pl.BlockSpec((1, bn), lambda i, j: (0, j)),
        ]
        if has_res:
            in_specs.append(pl.BlockSpec((bm, bn), lambda i, j: (i, j)))
        out = pl.pallas_call(
            functools.partial(_mm_kernel_single, do_relu=relu, has_res=has_res,
                              res_first=res_before_scale),
            out_shape=jax.ShapeDtypeStruct((Mp, Np), out_dtype),
            grid_spec=pltpu.PrefetchScalarGridSpec(
                num_scalar_prefetch=0,
                grid=(Mp // bm, Np // bn),
                in_specs=in_specs,
                out_specs=pl.BlockSpec((bm, bn), lambda i, j: (i, j)),
            ),
            compiler_params=cparams,
        )(*inputs)
    else:
        in_specs = [
            pl.BlockSpec((bm, bk), lambda i, j, k: (i, k)),
            pl.BlockSpec((bk, bn), lambda i, j, k: (k, j)),
            pl.BlockSpec((1, bn), lambda i, j, k: (0, j)),
            pl.BlockSpec((1, bn), lambda i, j, k: (0, j)),
        ]
        if has_res:
            in_specs.append(pl.BlockSpec((bm, bn), lambda i, j, k: (i, j)))
        out = pl.pallas_call(
            functools.partial(_mm_kernel_multi, do_relu=relu, has_res=has_res,
                              res_first=res_before_scale),
            out_shape=jax.ShapeDtypeStruct((Mp, Np), out_dtype),
            grid_spec=pltpu.PrefetchScalarGridSpec(
                num_scalar_prefetch=0,
                grid=(Mp // bm, Np // bn, Kp // bk),
                in_specs=in_specs,
                out_specs=pl.BlockSpec((bm, bn), lambda i, j, k: (i, j)),
                scratch_shapes=[pltpu.VMEM((bm, bn), jnp.float32)],
            ),
            compiler_params=cparams,
        )(*inputs)

    if Mp == M and Np == N:
        return out
    return out[:M, :N]


# ----------------------------------------------------------------------------
# One-time weight preparation (BN fold, bf16 cast, matmul layout, padding)
# ----------------------------------------------------------------------------
def bn_fold(bn, eps=1e-5):
    s = bn['gamma'] / jnp.sqrt(bn['var'] + eps)
    b = bn['beta'] - bn['mean'] * s
    return s, b


def prep_matmul(B, scale, bias):
    """B: [K, N] f32 -> matmul-ready dict (bf16, padded, tile plan)."""
    K, N = B.shape
    fb = N < 32                               # tiny outputs: use XLA dot instead
    d = dict(K=K, N=N, fallback=fb)
    if fb:
        d['B'] = B.astype(jnp.bfloat16)
        d['scale'] = scale.astype(jnp.float32)
        d['bias'] = bias.astype(jnp.float32)
    else:
        Kp, bk = _split_dim(K, 128, _BK_CAP)
        Np, bn = _split_dim(N, 128, _BN_CAP)
        d['B'] = jnp.pad(B.astype(jnp.bfloat16), ((0, Kp - K), (0, Np - N)))
        d['scale'] = jnp.pad(scale.astype(jnp.float32).reshape(1, N),
                             ((0, 0), (0, Np - N)))
        d['bias'] = jnp.pad(bias.astype(jnp.float32).reshape(1, N),
                            ((0, 0), (0, Np - N)))
        d.update(Kp=Kp, bk=bk, Np=Np, bn=bn)
    return d


def prep_conv(w, scale=None, bias=None):
    """w: [Cout, Cin, KH, KW] -> prepared conv-as-matmul dict."""
    Cout, Cin, KH, KW = w.shape
    if scale is None:
        scale = jnp.ones((Cout,), jnp.float32)
    if bias is None:
        bias = jnp.zeros((Cout,), jnp.float32)
    B = jnp.transpose(w, (2, 3, 1, 0)).reshape(KH * KW * Cin, Cout)
    d = prep_matmul(B, scale, bias)
    d.update(KH=KH, KW=KW, Cin=Cin, Cout=Cout)
    return d


def prep_deconv(w_t, scale, bias):
    """ConvTranspose2d(k3,s2,p1,op1) weight [Cin,Cout,3,3] -> sub-pixel matmul.

    B' has 4 input taps (2x2 neighbourhood) x Cin rows and 4 phases x Cout cols;
    out[2h+py, 2w+px] = sum_{ty,tx} x[h+ty, w+tx] . w_t[:, :, py+1-2ty, px+1-2tx].
    """
    w = np.asarray(w_t, np.float32)
    Cin, Cout = w.shape[0], w.shape[1]
    Bp = np.zeros((2, 2, Cin, 2, 2, Cout), np.float32)
    for py in range(2):
        for px in range(2):
            for ty in range(2):
                for tx in range(2):
                    ky, kx = py + 1 - 2 * ty, px + 1 - 2 * tx
                    if 0 <= ky < 3 and 0 <= kx < 3:
                        Bp[ty, tx, :, py, px, :] = w[:, :, ky, kx]
    B = jnp.asarray(Bp.reshape(4 * Cin, 4 * Cout))
    d = prep_matmul(B, jnp.tile(scale.astype(jnp.float32), 4),
                    jnp.tile(bias.astype(jnp.float32), 4))
    d.update(Cin=Cin, Cout=Cout)
    return d


# ----------------------------------------------------------------------------
# Convolution wrappers (NHWC activations, bf16; matmul in Pallas)
# ----------------------------------------------------------------------------
def conv2d(x, pw, *, stride=1, padding=0, relu=False, residual=None,
           res_before_scale=False, out_dtype=jnp.bfloat16):
    """x: [N,H,W,Cin] bf16; pw: prepared conv dict -> [N,OH,OW,Cout]."""
    N, H, W, Cin = x.shape
    KH, KW, Cout = pw['KH'], pw['KW'], pw['Cout']
    xb = x.astype(jnp.bfloat16)

    if KH == 1 and KW == 1 and padding == 0:
        xs = xb[:, ::stride, ::stride, :] if stride > 1 else xb
        OH, OW = xs.shape[1], xs.shape[2]
        A = xs.reshape(N * OH * OW, Cin)
    else:
        xp = jnp.pad(xb, ((0, 0), (padding, padding), (padding, padding), (0, 0)))
        Hp, Wp = H + 2 * padding, W + 2 * padding
        OH = (Hp - KH) // stride + 1
        OW = (Wp - KW) // stride + 1
        cols = []
        for kh in range(KH):
            for kw in range(KW):
                cols.append(xp[:, kh:kh + stride * (OH - 1) + 1:stride,
                               kw:kw + stride * (OW - 1) + 1:stride, :])
        A = jnp.concatenate(cols, axis=-1).reshape(N * OH * OW, KH * KW * Cin)

    res2d = None
    if residual is not None:
        res2d = residual.reshape(N * OH * OW, Cout)

    out = matmul_prepped(A, pw, relu=relu, residual=res2d,
                         res_before_scale=res_before_scale, out_dtype=out_dtype)
    return out.reshape(N, OH, OW, Cout)


def conv_transpose2d(x, pw, *, relu=False, out_dtype=jnp.bfloat16):
    """ConvTranspose2d(k3,s2,p1,op1) via sub-pixel matmul + depth-to-space."""
    N, H, W, Cin = x.shape
    Cout = pw['Cout']
    xb = x.astype(jnp.bfloat16)
    xp = jnp.pad(xb, ((0, 0), (0, 1), (0, 1), (0, 0)))     # zero row/col bottom+right
    A = jnp.concatenate([xp[:, 0:H, 0:W, :], xp[:, 0:H, 1:W + 1, :],
                         xp[:, 1:H + 1, 0:W, :], xp[:, 1:H + 1, 1:W + 1, :]],
                        axis=-1).reshape(N * H * W, 4 * Cin)
    out = matmul_prepped(A, pw, relu=relu, out_dtype=out_dtype)   # [N*H*W, 4*Cout]
    out = out.reshape(N, H, W, 2, 2, Cout)
    out = jnp.transpose(out, (0, 1, 3, 2, 4, 5)).reshape(N, 2 * H, 2 * W, Cout)
    return out


# ----------------------------------------------------------------------------
# Elementwise / gather glue (plain JAX, NHWC, bf16)
# ----------------------------------------------------------------------------
def bn_relu(x, p):
    return jnp.maximum(x * p['s'] + p['b'], 0.0).astype(jnp.bfloat16)


def maxpool_3x3_s2_p1(x):
    init = jnp.array(-jnp.inf, x.dtype)
    return lax.reduce_window(x, init, lax.max, (1, 3, 3, 1), (1, 2, 2, 1),
                             [(0, 0), (1, 1), (1, 1), (0, 0)])


def adaptive_avg_pool(x, oh, ow):
    N, H, W, C = x.shape
    xf = x.astype(jnp.float32)
    rows = []
    for i in range(oh):
        hs, he = (i * H) // oh, -(-((i + 1) * H) // oh)
        cols = []
        for j in range(ow):
            ws, we = (j * W) // ow, -(-((j + 1) * W) // ow)
            cols.append(jnp.mean(xf[:, hs:he, ws:we, :], axis=(1, 2)))
        rows.append(jnp.stack(cols, axis=1))
    return jnp.stack(rows, axis=1).astype(x.dtype)


def interpolate_bilinear_ac(x, out_h, out_w):
    """F.interpolate(mode='bilinear', align_corners=True), NHWC."""
    N, H, W, C = x.shape

    def coords(out, inn):
        if out == 1:
            return jnp.zeros((1,), jnp.float32)
        return jnp.arange(out, dtype=jnp.float32) * ((inn - 1) / (out - 1))

    ys, xs = coords(out_h, H), coords(out_w, W)
    y0 = jnp.floor(ys).astype(jnp.int32)
    y1 = jnp.minimum(y0 + 1, H - 1)
    x0 = jnp.floor(xs).astype(jnp.int32)
    x1 = jnp.minimum(x0 + 1, W - 1)
    wy = (ys - y0.astype(jnp.float32))[None, :, None, None]
    wx = (xs - x0.astype(jnp.float32))[None, None, :, None]
    xf = x.astype(jnp.float32)
    rows = xf[:, y0, :, :] * (1 - wy) + xf[:, y1, :, :] * wy
    out = rows[:, :, x0, :] * (1 - wx) + rows[:, :, x1, :] * wx
    return out.astype(x.dtype)


def grid_sample(inp, grid):
    """F.grid_sample bilinear, padding_mode='zeros', align_corners=False (NHWC)."""
    N, H, W, C = inp.shape
    OH, OW = grid.shape[1], grid.shape[2]
    gx, gy = grid[..., 0], grid[..., 1]
    ix = ((gx + 1.0) * W - 1.0) * 0.5
    iy = ((gy + 1.0) * H - 1.0) * 0.5
    x0f, y0f = jnp.floor(ix), jnp.floor(iy)
    flat = inp.reshape(N, H * W, C).astype(jnp.float32)

    def gather(xf, yf):
        valid = (xf >= 0) & (xf <= W - 1) & (yf >= 0) & (yf <= H - 1)
        xi = jnp.clip(xf, 0, W - 1).astype(jnp.int32)
        yi = jnp.clip(yf, 0, H - 1).astype(jnp.int32)
        idx = jnp.broadcast_to((yi * W + xi).reshape(N, OH * OW, 1), (N, OH * OW, C))
        g = jnp.take_along_axis(flat, idx, axis=1).reshape(N, OH, OW, C)
        return g * valid.reshape(N, OH, OW, 1).astype(jnp.float32)

    wx1, wy1 = ix - x0f, iy - y0f
    wx0, wy0 = 1.0 - wx1, 1.0 - wy1

    def w_(a):
        return a.reshape(N, OH, OW, 1)

    out = (gather(x0f, y0f) * w_(wx0 * wy0)
           + gather(x0f + 1, y0f) * w_(wx1 * wy0)
           + gather(x0f, y0f + 1) * w_(wx0 * wy1)
           + gather(x0f + 1, y0f + 1) * w_(wx1 * wy1))
    return out.astype(inp.dtype)


def grid_sample_with_delta(inp, size, delta):
    """bilinear_interpolate_torch_gridsample (s=1, default align_corners), NHWC."""
    out_h, out_w = size
    _, H, W, _ = inp.shape
    ys = jnp.linspace(-1.0, 1.0, out_h)
    xs = jnp.linspace(-1.0, 1.0, out_w)
    gx = jnp.broadcast_to(xs[None, :], (out_h, out_w))
    gy = jnp.broadcast_to(ys[:, None], (out_h, out_w))
    grid = jnp.stack([gx, gy], axis=-1)[None].astype(jnp.float32)
    norm = jnp.array([float(W), float(H)], jnp.float32)
    grid = grid + delta.astype(jnp.float32) / norm
    return grid_sample(inp, grid)


# ----------------------------------------------------------------------------
# Parameter construction (deterministic, mirrors the PyTorch module)
# ----------------------------------------------------------------------------
class ParamGen:
    def __init__(self, seed):
        self.key = jax.random.PRNGKey(seed)

    def _next(self):
        self.key, k = jax.random.split(self.key)
        return k

    def conv(self, cout, cin, kh, kw, zero=False):
        if zero:
            return jnp.zeros((cout, cin, kh, kw), jnp.float32)
        std = math.sqrt(2.0 / (cin * kh * kw))
        return jax.random.normal(self._next(), (cout, cin, kh, kw), jnp.float32) * std

    def convt(self, cin, cout, k):
        std = math.sqrt(2.0 / (cin * k * k))
        return jax.random.normal(self._next(), (cin, cout, k, k), jnp.float32) * std

    def bias(self, cout):
        return jax.random.normal(self._next(), (cout,), jnp.float32) * 0.01

    def bn(self, c):
        return dict(gamma=jnp.ones((c,), jnp.float32),
                    beta=jnp.zeros((c,), jnp.float32),
                    mean=jnp.zeros((c,), jnp.float32),
                    var=jnp.ones((c,), jnp.float32))


def make_bottleneck(pg, inplanes, planes, stride, has_down):
    p = dict(conv1=pg.conv(planes, inplanes, 1, 1), bn1=pg.bn(planes),
             conv2=pg.conv(planes, planes, 3, 3), bn2=pg.bn(planes),
             conv3=pg.conv(planes * 4, planes, 1, 1), bn3=pg.bn(planes * 4),
             stride=stride)
    if has_down:
        p['down_w'] = pg.conv(planes * 4, inplanes, 1, 1)
        p['down_bn'] = pg.bn(planes * 4)
    return p


def make_rrb(pg, features, out_features=256):
    return dict(unify=pg.conv(out_features, features, 1, 1),
                r1=pg.conv(out_features // 4, out_features, 3, 3),
                r1bn=pg.bn(out_features // 4),
                r2=pg.conv(out_features, out_features // 4, 3, 3),
                norm=pg.bn(out_features))


def make_delta_gen(pg, in_ch, mid):
    return dict(c1=pg.conv(mid, in_ch, 1, 1), bn=pg.bn(mid),
                c2=pg.conv(2, mid, 3, 3, zero=True))   # zero-init as in __init__


def make_cab(pg, features):
    return dict(dg1=make_delta_gen(pg, features * 2, features),
                dg2=make_delta_gen(pg, features * 2, features))


def make_cam(pg, features=2048, in_features=256):
    return dict(pool_c1=pg.conv(features, features, 1, 1), pool_bn1=pg.bn(features),
                pool_c2=pg.conv(in_features, features, 3, 3), pool_bn2=pg.bn(in_features),
                ad_c1=pg.conv(features, features, 1, 1), ad_bn1=pg.bn(features),
                ad_c2=pg.conv(in_features, features, 3, 3), ad_bn2=pg.bn(in_features),
                dg=make_delta_gen(pg, in_features * 2, in_features))


def make_head(pg):
    return dict(c1=pg.conv(256, 256, 3, 3), b1=pg.bias(256), bn=pg.bn(256),
                c2=pg.conv(128, 256, 3, 3), b2=pg.bias(128))


def make_decoder(pg, cin, cmid, cout):
    return dict(conv=pg.conv(cmid, cin, 3, 3), bn1=pg.bn(cmid),
                deconv=pg.convt(cmid, cout, 3), bn2=pg.bn(cout))


def make_resnet_params(seed=0, layers=(1, 1, 1, 1)):
    pg = ParamGen(seed)
    P = {}
    P['conv1'] = dict(w=pg.conv(64, 1, 3, 3), bn=pg.bn(64))
    P['bn1'] = pg.bn(64)
    P['conv2'] = dict(w=pg.conv(64, 64, 3, 3), bn=pg.bn(64))
    P['bn2'] = pg.bn(64)
    P['conv3'] = dict(w=pg.conv(128, 64, 3, 3), bn=pg.bn(128))
    P['bn3'] = pg.bn(128)

    inplanes = [128]

    def make_layer(planes, blocks, stride):
        ps = []
        has_down = (stride != 1) or (inplanes[0] != planes * 4)
        ps.append(make_bottleneck(pg, inplanes[0], planes, stride, has_down))
        inplanes[0] = planes * 4
        for _ in range(1, blocks):
            ps.append(make_bottleneck(pg, inplanes[0], planes, 1, False))
        return ps

    P['layer1'] = make_layer(64, layers[0], 1)
    P['layer2'] = make_layer(128, layers[1], 2)
    P['layer3'] = make_layer(256, layers[2], 2)
    P['layer4'] = make_layer(512, layers[3], 2)
    P['CAM'] = make_cam(pg, 2048, 256)
    P['RRB5a'] = make_rrb(pg, 256, 256); P['CAB5'] = make_cab(pg, 256); P['RRB5b'] = make_rrb(pg, 256, 256)
    P['RRB4a'] = make_rrb(pg, 2048, 256); P['CAB4'] = make_cab(pg, 256); P['RRB4b'] = make_rrb(pg, 256, 256)
    P['RRB3a'] = make_rrb(pg, 1024, 256); P['CAB3'] = make_cab(pg, 256); P['RRB3b'] = make_rrb(pg, 256, 256)
    P['RRB2a'] = make_rrb(pg, 512, 256); P['CAB2'] = make_cab(pg, 256); P['RRB2b'] = make_rrb(pg, 256, 256)
    P['RRB1a'] = make_rrb(pg, 256, 256)
    P['dsn'] = make_head(pg)
    P['head'] = make_head(pg)
    P['up1'] = make_decoder(pg, 128, 64, 64)
    P['up2'] = make_decoder(pg, 64, 32, 4)   # out_channels=4 (as set in __init__)
    return P


# ----------------------------------------------------------------------------
# One-time preparation of the whole parameter tree (runs ONCE, outside forward)
# ----------------------------------------------------------------------------
def prepare_params(P):
    Q = {}

    def cbr(p):                               # _ConvBNReLU: conv + folded BN
        s, b = bn_fold(p['bn'])
        return prep_conv(p['w'], s, b)

    Q['conv1'], Q['conv2'], Q['conv3'] = cbr(P['conv1']), cbr(P['conv2']), cbr(P['conv3'])
    for k in ('bn1', 'bn2', 'bn3'):
        s, b = bn_fold(P[k])
        Q[k] = dict(s=s, b=b)

    def prep_block(bp):
        d = dict(stride=bp['stride'],
                 conv1=prep_conv(bp['conv1'], *bn_fold(bp['bn1'])),
                 conv2=prep_conv(bp['conv2'], *bn_fold(bp['bn2'])),
                 conv3=prep_conv(bp['conv3'], *bn_fold(bp['bn3'])))
        if 'down_w' in bp:
            d['down'] = prep_conv(bp['down_w'], *bn_fold(bp['down_bn']))
        return d

    for name in ('layer1', 'layer2', 'layer3', 'layer4'):
        Q[name] = [prep_block(bp) for bp in P[name]]

    def prep_rrb(rp):
        return dict(unify=prep_conv(rp['unify']),
                    r1=prep_conv(rp['r1'], *bn_fold(rp['r1bn'])),
                    r2=prep_conv(rp['r2'], *bn_fold(rp['norm'])))

    for name in ('RRB1a', 'RRB2a', 'RRB2b', 'RRB3a', 'RRB3b',
                 'RRB4a', 'RRB4b', 'RRB5a', 'RRB5b'):
        Q[name] = prep_rrb(P[name])

    def prep_cab(cp):
        # Both delta-gen branches read the same concat: fuse their 1x1 convs.
        w1, w2 = cp['dg1']['c1'], cp['dg2']['c1']
        s1, b1 = bn_fold(cp['dg1']['bn'])
        s2, b2 = bn_fold(cp['dg2']['bn'])
        fused = prep_conv(jnp.concatenate([w1, w2], axis=0),
                          jnp.concatenate([s1, s2]), jnp.concatenate([b1, b2]))
        return dict(c1_fused=fused, split=int(w1.shape[0]),
                    dg1_c2=prep_conv(cp['dg1']['c2']),
                    dg2_c2=prep_conv(cp['dg2']['c2']))

    for name in ('CAB2', 'CAB3', 'CAB4', 'CAB5'):
        Q[name] = prep_cab(P[name])

    cam = P['CAM']
    Q['CAM'] = dict(
        pool_c1=prep_conv(cam['pool_c1'], *bn_fold(cam['pool_bn1'])),
        pool_c2=prep_conv(cam['pool_c2'], *bn_fold(cam['pool_bn2'])),
        ad_c1=prep_conv(cam['ad_c1'], *bn_fold(cam['ad_bn1'])),
        ad_c2=prep_conv(cam['ad_c2'], *bn_fold(cam['ad_bn2'])),
        dg_c1=prep_conv(cam['dg']['c1'], *bn_fold(cam['dg']['bn'])),
        dg_c2=prep_conv(cam['dg']['c2']))

    def prep_head(hp):
        s, b = bn_fold(hp['bn'])
        return dict(c1=prep_conv(hp['c1'], s, hp['b1'] * s + b),    # conv bias thru BN
                    c2=prep_conv(hp['c2'], None, hp['b2']))

    Q['dsn'] = prep_head(P['dsn'])
    Q['head'] = prep_head(P['head'])

    def prep_dec(dp):
        s2, b2 = bn_fold(dp['bn2'])
        return dict(conv=prep_conv(dp['conv'], *bn_fold(dp['bn1'])),
                    deconv=prep_deconv(dp['deconv'], s2, b2))

    Q['up1'] = prep_dec(P['up1'])
    Q['up2'] = prep_dec(P['up2'])
    return Q


# ----------------------------------------------------------------------------
# Module applications (NHWC, bf16 activations)
# ----------------------------------------------------------------------------
def apply_bottleneck(x, p):
    if 'down' in p:
        residual = conv2d(x, p['down'], stride=p['stride'], padding=0)
    else:
        residual = x
    out = conv2d(x, p['conv1'], padding=0, relu=True)
    out = conv2d(out, p['conv2'], stride=p['stride'], padding=1, relu=True)
    # relu(bn3(conv3(out)) + residual) fused into the matmul epilogue
    return conv2d(out, p['conv3'], padding=0, relu=True, residual=residual)


def apply_layer(x, blocks):
    for bp in blocks:
        x = apply_bottleneck(x, bp)
    return x


def apply_rrb(x, p):
    feats = conv2d(x, p['unify'], padding=0)
    r = conv2d(feats, p['r1'], padding=1)
    # norm(feats + conv(r)) == (conv(r) + feats) * s_norm + b_norm  (fused)
    return conv2d(r, p['r2'], padding=1, residual=feats, res_before_scale=True)


def apply_cab(low, high, p):
    h, w = low.shape[1], low.shape[2]
    high = interpolate_bilinear_ac(high, h, w)
    concat = jnp.concatenate([low, high], axis=-1)
    y = conv2d(concat, p['c1_fused'], padding=0)          # fused dg1.c1 + dg2.c1
    c1 = p['split']
    d1 = conv2d(y[..., :c1], p['dg1_c2'], padding=1)       # Cout=2 -> XLA fallback
    d2 = conv2d(y[..., c1:], p['dg2_c2'], padding=1)
    high = grid_sample_with_delta(high, (h, w), d1)
    low = grid_sample_with_delta(low, (h, w), d2)
    return high + low


def apply_cam(x, p):
    _, h, w, _ = x.shape
    hs = adaptive_avg_pool(x, 3, 3)
    hs = conv2d(hs, p['pool_c1'], padding=0)
    hs = conv2d(hs, p['pool_c2'], padding=1)
    ls = conv2d(x, p['ad_c1'], padding=0)
    ls = conv2d(ls, p['ad_c2'], padding=1)
    hs_up = interpolate_bilinear_ac(hs, h, w)
    concat = jnp.concatenate([ls, hs_up], axis=-1)
    dly = conv2d(concat, p['dg_c1'], padding=0)
    delta = conv2d(dly, p['dg_c2'], padding=1)              # Cout=2 -> XLA fallback
    hs = grid_sample_with_delta(hs, (h, w), delta)
    return hs + ls


def apply_head(x, p, add=None):
    x = conv2d(x, p['c1'], padding=1)
    # Dropout2d(0.1) is identity in eval mode; the final `out + dsn` is fused.
    return conv2d(x, p['c2'], padding=1, residual=add)


def apply_decoder(x, p):
    x = conv2d(x, p['conv'], padding=1, relu=True)
    return conv_transpose2d(x, p['deconv'], relu=True)


def resnet_forward(x_nchw, Q):
    # Single NCHW -> NHWC layout change at entry; bf16 activations end-to-end.
    x = jnp.transpose(x_nchw, (0, 2, 3, 1)).astype(jnp.bfloat16)

    x = bn_relu(conv2d(x, Q['conv1'], stride=2, padding=1, relu=True), Q['bn1'])
    x = bn_relu(conv2d(x, Q['conv2'], stride=1, padding=1, relu=True), Q['bn2'])
    x = bn_relu(conv2d(x, Q['conv3'], stride=1, padding=1, relu=True), Q['bn3'])
    x = maxpool_3x3_s2_p1(x)

    x1 = apply_layer(x, Q['layer1'])
    d1 = apply_rrb(x1, Q['RRB1a'])

    x2 = apply_layer(x1, Q['layer2'])
    d2 = apply_rrb(x2, Q['RRB2a'])
    d2 = apply_cab(d1, d2, Q['CAB2'])
    d2 = apply_rrb(d2, Q['RRB2b'])

    x3 = apply_layer(x2, Q['layer3'])
    d3 = apply_rrb(x3, Q['RRB3a'])
    d3 = apply_cab(d2, d3, Q['CAB3'])
    d3 = apply_rrb(d3, Q['RRB3b'])
    dsn = apply_head(d3, Q['dsn'])

    x4 = apply_layer(x3, Q['layer4'])
    d4 = apply_rrb(x4, Q['RRB4a'])
    d4 = apply_cab(d3, d4, Q['CAB4'])
    d4 = apply_rrb(d4, Q['RRB4b'])

    x5 = apply_cam(x4, Q['CAM'])
    d5 = apply_rrb(x5, Q['RRB5a'])
    d5 = apply_cab(d4, d5, Q['CAB5'])
    d5 = apply_rrb(d5, Q['RRB5b'])

    outs = apply_head(d5, Q['head'], add=dsn)   # head(d5) + dsn fused
    outs = apply_decoder(outs, Q['up1'])
    outs = apply_decoder(outs, Q['up2'])

    # Single NHWC -> NCHW layout change at exit.
    return jnp.transpose(outs, (0, 3, 1, 2)).astype(jnp.float32)


# ----------------------------------------------------------------------------
if __name__ == "__main__":
    key = jax.random.PRNGKey(0)
    k_in, _ = jax.random.split(key)

    # Input follows the module's stem: _ConvBNReLU(1, 64, 3, 2) -> 1 channel.
    # 64x64 keeps every stage (overall /32 downsample) at >=2x2 spatial size.
    x = jax.random.normal(k_in, (1, 1, 64, 64), jnp.float32)

    raw_params = make_resnet_params(seed=0, layers=(1, 1, 1, 1))  # Bottleneck x4
    params = prepare_params(raw_params)   # BN-fold / bf16 / pad happens ONCE here

    out = resnet_forward(x, params)
    out = jax.block_until_ready(out)

    assert out.shape == (1, 4, 64, 64), out.shape
    assert bool(jnp.all(jnp.isfinite(out)))
    print("KERNEL_OK")
</pallas_src>

<mosaic_0001>
module attributes {stable_mosaic.version = 11 : i64} {
  func.func @_mm_kernel_single(%arg0: i32, %arg1: i32, %arg2: memref<256x128xbf16, #tpu.memory_space<vmem>>, %arg3: memref<128x128xbf16, #tpu.memory_space<vmem>>, %arg4: memref<1x128xf32, #tpu.memory_space<vmem>>, %arg5: memref<1x128xf32, #tpu.memory_space<vmem>>, %arg6: memref<256x128xbf16, #tpu.memory_space<vmem>>) attributes {dimension_semantics = [#tpu.dimension_semantics<parallel>, #tpu.dimension_semantics<parallel>], iteration_bounds = array<i64: 4, 1>, scalar_prefetch = 0 : i64, scratch_operands = 0 : i64, tpu.core_type = #tpu.core_type<tc>, window_params = [{transform_indices = @transform_0, window_bounds = array<i64: 256, 128>}, {transform_indices = @transform_1, window_bounds = array<i64: 128, 128>}, {transform_indices = @transform_2, window_bounds = array<i64: 1, 128>}, {transform_indices = @transform_3, window_bounds = array<i64: 1, 128>}, {transform_indices = @transform_4, window_bounds = array<i64: 256, 128>}]} {
    %c0 = arith.constant 0 : index
    %c0_0 = arith.constant 0 : index
    %0 = vector.load %arg2[%c0, %c0_0] : memref<256x128xbf16, #tpu.memory_space<vmem>>, vector<256x128xbf16>
    %c0_1 = arith.constant 0 : index
    %c0_2 = arith.constant 0 : index
    %1 = vector.load %arg3[%c0_1, %c0_2] : memref<128x128xbf16, #tpu.memory_space<vmem>>, vector<128x128xbf16>
    %cst = arith.constant dense<0.000000e+00> : vector<256x128xf32>
    %2 = tpu.matmul %0, %1, %cst {dimension_numbers = #tpu.dot_dimension_numbers<[1], [0], [0], [1], [0, 0, 1, 1], [], []>} : vector<256x128xbf16>, vector<128x128xbf16>, vector<256x128xf32> -> vector<256x128xf32>
    %c0_3 = arith.constant 0 : index
    %c0_4 = arith.constant 0 : index
    %3 = vector.load %arg4[%c0_3, %c0_4] : memref<1x128xf32, #tpu.memory_space<vmem>>, vector<1x128xf32>
    %4 = vector.broadcast %3 : vector<1x128xf32> to vector<256x128xf32>
    %5 = arith.mulf %2, %4 : vector<256x128xf32>
    %c0_5 = arith.constant 0 : index
    %c0_6 = arith.constant 0 : index
    %6 = vector.load %arg5[%c0_5, %c0_6] : memref<1x128xf32, #tpu.memory_space<vmem>>, vector<1x128xf32>
    %7 = vector.broadcast %6 : vector<1x128xf32> to vector<256x128xf32>
    %8 = arith.addf %5, %7 : vector<256x128xf32>
    %cst_7 = arith.constant 0.000000e+00 : f32
    %9 = vector.broadcast %cst_7 : f32 to vector<256x128xf32>
    %10 = arith.maximumf %8, %9 : vector<256x128xf32>
    %11 = arith.truncf %10 : vector<256x128xf32> to vector<256x128xbf16>
    %c0_8 = arith.constant 0 : index
    %c0_9 = arith.constant 0 : index
    %12 = vector.load %arg6[%c0_8, %c0_9] : memref<256x128xbf16, #tpu.memory_space<vmem>>, vector<256x128xbf16>
    tpu.vector_store %arg6[%c0_8, %c0_9], %11 {strides = array<i32>} : memref<256x128xbf16, #tpu.memory_space<vmem>>, vector<256x128xbf16>,
    return
  }
  func.func @transform_0(%arg0: i32, %arg1: i32) -> (i32, i32) {
    %c0_i32 = arith.constant 0 : i32
    %c0_i32_0 = arith.constant 0 : i32
    return %arg0, %c0_i32 : i32, i32
  }
  func.func @transform_1(%arg0: i32, %arg1: i32) -> (i32, i32) {
    %c0_i32 = arith.constant 0 : i32
    %c0_i32_0 = arith.constant 0 : i32
    return %c0_i32, %arg1 : i32, i32
  }
  func.func @transform_2(%arg0: i32, %arg1: i32) -> (i32, i32) {
    %c0_i32 = arith.constant 0 : i32
    %c0_i32_0 = arith.constant 0 : i32
    return %c0_i32, %arg1 : i32, i32
  }
  func.func @transform_3(%arg0: i32, %arg1: i32) -> (i32, i32) {
    %c0_i32 = arith.constant 0 : i32
    %c0_i32_0 = arith.constant 0 : i32
    return %c0_i32, %arg1 : i32, i32
  }
  func.func @transform_4(%arg0: i32, %arg1: i32) -> (i32, i32) {
    %c0_i32 = arith.constant 0 : i32
    return %arg0, %arg1 : i32, i32
  }
}

</mosaic_0001>

<bundles_post_ra>
// kernel: tpu_custom_call.1
= control target key start
LH: loop header
LB: loop body
LE: loop exit
PB: predicated region body
PF: predicated region fallthrough
CT: control target
= control target key end

     0   :  { %9 = vsyncpa [#allocation3], 0  ;;  %s1951_s0 = inlined_call_operand.hbm [shape: bf16[1024,128], index: 0, kind: input, shape index: {}]   ;;  %s1952_s1 = inlined_call_operand.hbm [shape: bf16[128,128], index: 1, kind: input, shape index: {}]   ;;  %s1953_s2 = inlined_call_operand.vmem [shape: f32[1,128], index: 2, kind: input, shape index: {}]   ;;  %s1954_s3 = inlined_call_operand.vmem [shape: f32[1,128], index: 3, kind: input, shape index: {}]   ;;  %s1955_s4 = inlined_call_operand.hbm [shape: bf16[1024,128], index: 4, kind: output, shape index: {}]  }
   0x1   :  { %11 = vsyncpa [#allocation3 + $0x1], 0 }
   0x2   :  { %12 = vsyncpa [#allocation6], 0 }
   0x3   :  { %13 = vsyncpa [#allocation4], 0 }
   0x4   :  { %15 = vsyncpa [#allocation4 + $0x1], 0  ;;  %s1613_s15 = smov 0   ;;  %s1615_s16 = smov 0  }
   0x5   :  { %s1617_s17 = smov 0   ;;  %s1619_s18 = smov 0  }
   0x6   :  { %s1621_s19 = smov 0   ;;  %s1623_s20 = smov 0  }
   0x7 LB: > { %s1040_s21 = sadd.s32 4294967295, %s1579_s20   ;;  %s1041_s22 = sadd.s32 4294967294, %s1579_s20   ;;  %s1579_s20 = sphi %s1623_s20, %s21_s20   ;;  %s1575_s19 = sphi %s1621_s19, %s1978_s19   ;;  %s1571_s18 = sphi %s1619_s18, %s1977_s18   ;;  %s1567_s17 = sphi %s1617_s17, %s1976_s17   ;;  %s1563_s16 = sphi %s1615_s16, %s1975_s16   ;;  %s1559_s15 = sphi %s1613_s15, %s1974_s15  }
   0x8   : > { %p53_p0 = scmp.ne.s32.totalorder %s1563_s16, %s1559_s15  ;;  %p1647_p1 = scmp.eq.s32.totalorder %s1040_s21, 0 }
   0x9   : > { %p1651_p2 = scmp.eq.s32.totalorder %s1040_s21, 3  ;;  %p163_p3 = scmp.eq.s32.totalorder %s1041_s22, 3 }
   0xa   : > { %s1960_s23 = scalar_select %p1647_p1, 1, 0 }
   0xb   : > { %s1961_s24 = scalar_select %p1651_p2, 1, 0 }
   0xc   : > { %p1657_p4 = por %p1647_p1, %p53_p0  ;;  %p1042_p5 = scmp.ge.s32.totalorder %s1579_s20, 1 }
   0xd   : > { %p1662_p6 = por %p163_p3, %p53_p0  ;;  %p170_p7 = scmp.lt.s32.totalorder %s1579_s20, 5 }
   0xe   : > { %s1962_s25 = scalar_select %p1657_p4, 1, 0 }
   0xf   : > { %s1963_s26 = scalar_select %p1662_p6, 1, 0 }
  0x10   : > { %p1667_p8 = pnand %p1042_p5, %p170_p7  ;;  %s1581_s28 = smov [#allocation5]  }
  0x11   : > { %s184_s29 = sshll.u32 %s1581_s28, 4  ;;  %s33_s5 = sadd.s32 1, %s1575_s19  ;;  %s185_s29 = int_to_ptr.vmem [resolvable:$true] %s184_s29 }
  0x12   : > { %s1964_s27 = scalar_select %p1667_p8, 1, 0 }
  0x13   : > { %p1342_p9 = pneg %p1667_p8  ;;  %s1435_s8 = scalar_lea.hbm %s1952_s1, 1024 }
  0x14   : > { %p1436_p11 = scmp.ne.s32.totalorder %s1952_s1, %s1435_s8  ;;  %p1442_p3 = scmp.lt.u32.totalorder %s1435_s8, %s1952_s1 }
  0x15   : > { %p1675_p10 = pnand %p1342_p9, %p1647_p1 }
  0x17   : > { %p1437_p12 = pneg %p1675_p10 }
  0x19   : > { %p1438_p13 = pnand %p1437_p12, %p1436_p11 }
  0x1b   : > { %p1439_p0 = pneg %p1438_p13 }
  0x1d   : > { %p1444_p5 = pnand %p1442_p3, %p1439_p0 }
  0x1f   : > { %1447 = shalt.err (!%p1444_p5)
}
  0x20   : > { %s1448_s13 = scalar_lea.vmem %s185_s29, 1024  ;;  %p1456_p1 = scmp.lt.s32.totalorder %s185_s29, %s185_s29 }
  0x21   : > { %p1449_p7 = scmp.ne.s32.totalorder %s185_s29, %s1448_s13  ;;  %p1457_p4 = scmp.lt.s32.totalorder %s1448_s13, %s1448_s13 }
  0x23   : > { %p1451_p9 = pnand %p1449_p7, %p1437_p12  ;;  %p1458_p8 = por %p1457_p4, %p1456_p1 }
  0x25   : > { %p1452_p6 = pneg %p1451_p9 }
  0x27   : > { %p1459_p2 = pnand %p1458_p8, %p1452_p6 }
  0x29   : > { %1462 = shalt.err (!%p1459_p2)
}
  0x2a   : > { %s1582_s14 = smov 64   ;;  %s1583_s21 = smov 4  }
  0x2b   : > { %1345 = dma.hbm_to_vmem [thread:$0]  (!%p1675_p10), %s1952_s1, 1024, %s185_s29, [#allocation6], %s1582_s14, %s1582_s14, %s1583_s21  }
  0x2c   : > { %p35_p1 = scmp.ge.s32.totalorder %s33_s5, 4  ;;  %s40_s6 = sadd.s32 1, %s1567_s17 }
  0x2d   : > { %p47_p2 = scmp.ne.s32.totalorder %s1567_s17, %s1563_s16  ;;  %p48_p4 = scmp.eq.s32.totalorder %s1579_s20, 0 }
  0x2e   : > { %s1980_s5 = smov (%p35_p1, %s33_s5), 0  ;;  %p1967_p8 = scmp.ne.s32.totalorder %s1961_s24, 0 }
  0x2f   : > { %p1705_p6 = por %p48_p4, %p47_p2  ;;  %s37_s8 = ssub.s32 %s1575_s19, %s1980_s5 }
  0x30   : > { %p1711_p11 = por %p1967_p8, %p47_p2  ;;  %p1355_p12 = scmp.lt.s32.totalorder %s1579_s20, 4 }
  0x31   : > { %p38_p10 = scmp.eq.s32.totalorder %s37_s8, 0  ;;  %s210_s29 = sand.u32 1, %s1567_s17  }
  0x32   : > { %s1047_s9 = sshll.u32 %s210_s29, 7  ;;  %s1117_s11 = sshll.u32 %s1575_s19, 11 }
  0x33   : > { %s1720_s10 = scalar_select %p38_p10, %s1567_s17, %s40_s6  }
  0x34   : > { %s1726_s22 = scalar_lea.hbm %s1951_s0, %s1117_s11  ;;  %s214_s24 = scalar_lea.vmem [#allocation2], %s1047_s9 }
  0x35   : > { %s221_s28 = sshll.u32 %s214_s24, 4  ;;  %p1732_p13 = pnand %p1355_p12, %p1705_p6  ;;  %s1728_s28 = int_to_ptr.vmem [resolvable:$true] %s221_s28 }
  0x36   : > { %s1736_s6 = scalar_lea.sflag [#allocation3], %s210_s29  ;;  %s1463_s12 = scalar_lea.hbm %s1726_s22, 2048 }
  0x37   : > { %p1464_p0 = scmp.ne.s32.totalorder %s1726_s22, %s1463_s12  ;;  %p1465_p3 = pneg %p1732_p13 }
  0x38   : > { %s1468_s7 = scalar_lea.hbm %s1951_s0, 8192  ;;  %p1469_p9 = scmp.lt.u32.totalorder %s1726_s22, %s1951_s0 }
  0x39   : > { %p1466_p5 = pnand %p1465_p3, %p1464_p0  ;;  %p1470_p1 = scmp.lt.u32.totalorder %s1468_s7, %s1463_s12 }
  0x3a   : > { %p1472_p4 = scmp.lt.u32.totalorder %s1463_s12, %s1726_s22 }
  0x3b   : > { %p1467_p7 = pneg %p1466_p5  ;;  %p1471_p2 = por %p1470_p1, %p1469_p9 }
  0x3d   : > { %p1473_p6 = por %p1472_p4, %p1471_p2 }
  0x3f   : > { %p1474_p8 = pnand %p1473_p6, %p1467_p7 }
  0x41   : > { %1477 = shalt.err (!%p1474_p8)
}
  0x42   : > { %s1478_s29 = scalar_lea.vmem %s1728_s28, 2048  ;;  %s1584_s9 = smov [#allocation2]  }
  0x43   : > { %p1479_p12 = scmp.ne.s32.totalorder %s1728_s28, %s1478_s29  ;;  %s1483_s11 = sshll.u32 %s1584_s9, 4  ;;  %s1484_s11 = int_to_ptr.vmem [resolvable:$false] %s1483_s11 }
  0x44   : > { %s1485_s13 = scalar_lea.vmem %s1484_s11, 4096  ;;  %p1486_p5 = scmp.lt.s32.totalorder %s1728_s28, %s1484_s11 }
  0x45   : > { %p1481_p10 = pnand %p1479_p12, %p1465_p3  ;;  %p1487_p9 = scmp.lt.s32.totalorder %s1485_s13, %s1478_s29 }
  0x47   : > { %p1482_p0 = pneg %p1481_p10  ;;  %p1488_p1 = por %p1487_p9, %p1486_p5 }
  0x49   : > { %p1489_p2 = pnand %p1488_p1, %p1482_p0 }
  0x4b   : > { %1492 = shalt.err (!%p1489_p2)
}
  0x4c   : > { %1349 = dma.hbm_to_vmem [thread:$0]  (!%p1732_p13), %s1726_s22, 2048, %s1728_s28, %s1736_s6, %s1582_s14, %s1582_s14, %s1583_s21  }
  0x4d   : > { %p1970_p3 = scmp.ne.s32.totalorder %s1964_s27, 0 }
  0x4e   : > { %s1770_s12 = sand.u32 (!%p1970_p3), 1, %s1563_s16   ;;  %p1971_p7 = scmp.ne.s32.totalorder (!%p1970_p3), %s1962_s25, 0 }
  0x4f   : > { %233 = sbr.rel (%p1970_p3) target bundleno = 386 (0x182), region = 36  ;;  %s1051_s7 = sshll.u32 (!%p1970_p3), %s1770_s12, 7 }
  0x50   : > { %s236_s24 = scalar_lea.sflag (!%p1970_p3), [#allocation3], %s1770_s12  ;;  %s1776_s8 = scalar_lea.vmem (!%p1970_p3), [#allocation2], %s1051_s7 }
  0x56   : > { %1546 = dma.done.wait (%p1971_p7), %s236_s24, 2048  }
  0x57   : > { %1548 = vsyncadd (%p1971_p7), %s236_s24, 4294965248  ;;  %p1972_p13 = scmp.ne.s32.totalorder %s1960_s23, 0 }
  0x59   : > { %1550 = dma.done.wait (%p1972_p13), [#allocation6], 1024  }
  0x5a   : > { %1552 = vsyncadd (%p1972_p13), [#allocation6], 4294966272  ;;  %v1411_v0 = vld [vmem:[#allocation5] sm:$0xff]   ;;  %v1412_v1 = vld [vmem:[#allocation5 + $0x8] sm:$0xff]   ;;  %s1834_s21 = scalar_lea.vmem [#allocation7], %s1051_s7  ;;  %s1150_s22 = sshll.u32 %s1571_s18, 11 }
  0x5b   : > { %1270 = vmatprep.subr.bf16.mxu0 %v1411_v0  ;;  %1318 = vmatprep.subr.bf16.mxu1 %v1411_v0  ;;  %v1413_v2 = vld [vmem:[#allocation5 + $0x10] sm:$0xff]   ;;  %v1414_v3 = vld [vmem:[#allocation5 + $0x18] sm:$0xff]   ;;  %v1419_v4 = vld [vmem:[%s1776_s8] sm:$0xff]   ;;  %s921_s28 = sshll.u32 %s1834_s21, 4  ;;  %s1897_s18 = scalar_lea.hbm %s1955_s4, %s1150_s22  ;;  %s1899_s28 = int_to_ptr.vmem [resolvable:$true] %s921_s28 }
  0x5c   : > { %1271 = vmatpush3.bf16.msra.mxu0 %v1411_v0  ;;  %1326 = vmatpush3.bf16.msra.mxu1 %v1411_v0  ;;  %v1420_v5 = vld [vmem:[%s1776_s8 + $0x40] sm:$0xff]   ;;  %v1416_v7 = vld [vmem:[#allocation5 + $0x28] sm:$0xff]   ;;  %v1417_v8 = vld [vmem:[#allocation5 + $0x30] sm:$0xff]   ;;  %s907_s9 = scalar_lea.sflag [#allocation4], %s1770_s12  ;;  %s1493_s11 = scalar_lea.vmem %s1899_s28, 2048 }
  0x5d   : > { %1272 = vmatprep.subr.bf16.mxu0 %v1412_v1  ;;  %1319 = vmatprep.subr.bf16.mxu1 %v1412_v1  ;;  %v1415_v6 = vld [vmem:[#allocation5 + $0x20] sm:$0xff]   ;;  %v1418_v9 = vld [vmem:[#allocation5 + $0x38] sm:$0xff]   ;;  %v1421_v10 = vld [vmem:[%s1776_s8 + $0x8] sm:$0xff]   ;;  %p1494_p4 = scmp.ne.s32.totalorder %s1899_s28, %s1493_s11  ;;  %s1585_s13 = smov [#allocation7]  }
  0x5e   : > { %1286 = vmatprep.mubr.bf16.mxu0 %v1419_v4  ;;  %1302 = vmatprep.mubr.bf16.mxu1 %v1420_v5  ;;  %v1422_v11 = vld [vmem:[%s1776_s8 + $0x48] sm:$0xff]   ;;  %v1423_v12 = vld [vmem:[%s1776_s8 + $0x10] sm:$0xff]   ;;  %v1425_v14 = vld [vmem:[%s1776_s8 + $0x18] sm:$0xff]   ;;  %s1497_s7 = sshll.u32 %s1585_s13, 4  ;;  %s1498_s7 = int_to_ptr.vmem [resolvable:$false] %s1497_s7 }
  0x5f   : > { %v1424_v13 = vld [vmem:[%s1776_s8 + $0x50] sm:$0xff]   ;;  %v1426_v15 = vld [vmem:[%s1776_s8 + $0x58] sm:$0xff]   ;;  %v1427_v16 = vld [vmem:[%s1776_s8 + $0x20] sm:$0xff]   ;;  %p1495_p6 = pnand %p1494_p4, %p1711_p11  ;;  %s1499_s24 = scalar_lea.vmem %s1498_s7, 4096 }
  0x60   : > { %1273 = vmatpush3.bf16.msra.mxu0 %v1412_v1  ;;  %1327 = vmatpush3.bf16.msra.mxu1 %v1412_v1  ;;  %v1428_v17 = vld [vmem:[%s1776_s8 + $0x60] sm:$0xff]   ;;  %v1429_v18 = vld [vmem:[%s1776_s8 + $0x28] sm:$0xff]   ;;  %v1431_v20 = vld [vmem:[%s1776_s8 + $0x30] sm:$0xff]   ;;  %p1500_p12 = scmp.lt.s32.totalorder %s1899_s28, %s1498_s7  ;;  %p1501_p10 = scmp.lt.s32.totalorder %s1499_s24, %s1493_s11 }
  0x61   : > { %1274 = vmatprep.subr.bf16.mxu0 %v1413_v2  ;;  %1320 = vmatprep.subr.bf16.mxu1 %v1413_v2  ;;  %v1430_v19 = vld [vmem:[%s1776_s8 + $0x68] sm:$0xff]   ;;  %v1432_v21 = vld [vmem:[%s1776_s8 + $0x70] sm:$0xff]   ;;  %v1433_v22 = vld [vmem:[%s1776_s8 + $0x38] sm:$0xff]   ;;  %p1496_p8 = pneg %p1495_p6 }
  0x62   : > { %v1434_v23 = vld [vmem:[%s1776_s8 + $0x78] sm:$0xff]   ;;  %v1805_v24 = vld [vmem:[%s1953_s2] ss:$0 sm:$0xff]  ;;  %p1502_p0 = por %p1501_p10, %p1500_p12 }
  0x63   : > { %v1810_v26 = vld [vmem:[%s1954_s3] ss:$0 sm:$0xff] }
  0x64   : > { %1275 = vmatpush3.bf16.msra.mxu0 %v1413_v2  ;;  %1328 = vmatpush3.bf16.msra.mxu1 %v1413_v2  ;;  %p1503_p5 = pnand %p1502_p0, %p1496_p8 }
  0x65   : > { %1276 = vmatprep.subr.bf16.mxu0 %v1414_v3  ;;  %1321 = vmatprep.subr.bf16.mxu1 %v1414_v3 }
  0x68   : > { %1277 = vmatpush3.bf16.msra.mxu0 %v1414_v3  ;;  %1329 = vmatpush3.bf16.msra.mxu1 %v1414_v3 }
  0x69   : > { %1278 = vmatprep.subr.bf16.mxu0 %v1415_v6  ;;  %1322 = vmatprep.subr.bf16.mxu1 %v1415_v6 }
  0x6c   : > { %1279 = vmatpush3.bf16.msra.mxu0 %v1415_v6  ;;  %1330 = vmatpush3.bf16.msra.mxu1 %v1415_v6 }
  0x6d   : > { %1280 = vmatprep.subr.bf16.mxu0 %v1416_v7  ;;  %1323 = vmatprep.subr.bf16.mxu1 %v1416_v7 }
  0x70   : > { %1281 = vmatpush3.bf16.msra.mxu0 %v1416_v7  ;;  %1331 = vmatpush3.bf16.msra.mxu1 %v1416_v7 }
  0x71   : > { %1282 = vmatprep.subr.bf16.mxu0 %v1417_v8  ;;  %1324 = vmatprep.subr.bf16.mxu1 %v1417_v8 }
  0x74   : > { %1283 = vmatpush3.bf16.msra.mxu0 %v1417_v8  ;;  %1332 = vmatpush3.bf16.msra.mxu1 %v1417_v8 }
  0x75   : > { %1284 = vmatprep.subr.bf16.mxu0 %v1418_v9  ;;  %1325 = vmatprep.subr.bf16.mxu1 %v1418_v9 }
  0x78   : > { %1285 = vmatpush3.bf16.msra.mxu0 %v1418_v9  ;;  %1333 = vmatpush3.bf16.msra.mxu1 %v1418_v9 }
  0x7b   : > { %1287 = vmatmul.mubr.bf16.vlgmr.msra.gmra.mrb[0].mxu0 %v1421_v10  ;;  %1303 = vmatmul.mubr.bf16.vlgmr.msra.gmra.mrb[0].mxu1 %v1422_v11 }
  0x7c   : > { %1290 = vmatprep.mubr.bf16.mxu0 %v1423_v12  ;;  %1306 = vmatprep.mubr.bf16.mxu1 %v1424_v13 }
  0x83   : > { %1291 = vmatmul.mubr.bf16.gmra.mrb[4].mxu0 %v1425_v14  ;;  %1307 = vmatmul.mubr.bf16.gmra.mrb[4].mxu1 %v1426_v15 }
  0x84   : > { %1294 = vmatprep.mubr.bf16.mxu0 %v1427_v16  ;;  %1310 = vmatprep.mubr.bf16.mxu1 %v1428_v17 }
  0x8b   : > { %1295 = vmatmul.mubr.bf16.gmra.mrb[8].mxu0 %v1429_v18  ;;  %1311 = vmatmul.mubr.bf16.gmra.mrb[8].mxu1 %v1430_v19 }
  0x8c   : > { %1298 = vmatprep.mubr.bf16.mxu0 %v1431_v20  ;;  %1314 = vmatprep.mubr.bf16.mxu1 %v1432_v21 }
  0x93   : > { %1299 = vmatmul.mubr.bf16.gmra.mrb[12].mxu0 %v1433_v22  ;;  %1315 = vmatmul.mubr.bf16.gmra.mrb[12].mxu1 %v1434_v23 }
 0x14e   : > { %v1288_v25 = vpop.f32.mrb[0].mxu0  ;;  %v1304_v27 = vpop.f32.mrb[0].mxu1 }
 0x14f   : > { %v645_v28 = vmul.f32 %v1288_v25, %v1805_v24  ;;  %v661_v29 = vmul.f32 %v1304_v27, %v1805_v24  ;;  %v509_v30 = vpop.f32.mrb[1].mxu0  ;;  %v573_v31 = vpop.f32.mrb[1].mxu1 }
 0x150   : > { %v643_v32 = vmul.f32 %v1805_v24, %v509_v30  ;;  %v659_v33 = vmul.f32 %v1805_v24, %v573_v31  ;;  %v1289_v34 = vpop.f32.mrb[2].mxu0  ;;  %v1305_v35 = vpop.f32.mrb[2].mxu1 }
 0x151   : > { %v684_v36 = vadd.f32 %v1810_v26, %v645_v28  ;;  %v700_v37 = vadd.f32 %v1810_v26, %v661_v29  ;;  %v646_v38 = vmul.f32 %v1289_v34, %v1805_v24  ;;  %v662_v39 = vmul.f32 %v1305_v35, %v1805_v24  ;;  %v512_v40 = vpop.f32.mrb[3].mxu0  ;;  %v576_v41 = vpop.f32.mrb[3].mxu1 }
 0x152   : > { %v682_v42 = vadd.f32 %v1810_v26, %v643_v32  ;;  %v698_v43 = vadd.f32 %v1810_v26, %v659_v33  ;;  %v644_v44 = vmul.f32 %v1805_v24, %v512_v40  ;;  %v660_v45 = vmul.f32 %v1805_v24, %v576_v41 }
 0x153   : > { %v685_v46 = vadd.f32 %v1810_v26, %v646_v38  ;;  %v701_v47 = vadd.f32 %v1810_v26, %v662_v39  ;;  %v716_v50 = vmax.f32 %v684_v36, 0.0  ;;  %v732_v51 = vmax.f32 %v700_v37, 0.0 }
 0x154   : > { %v683_v48 = vadd.f32 %v1810_v26, %v644_v44  ;;  %v699_v49 = vadd.f32 %v1810_v26, %v660_v45  ;;  %v714_v54 = vmax.f32 %v682_v42, 0.0  ;;  %v730_v55 = vmax.f32 %v698_v43, 0.0 }
 0x155   : > { %v717_v52 = vmax.f32 %v685_v46, 0.0  ;;  %v733_v53 = vmax.f32 %v701_v47, 0.0 }
 0x156   : > { %v715_v56 = vmax.f32 %v683_v48, 0.0  ;;  %v731_v57 = vmax.f32 %v699_v49, 0.0  ;;  %v1292_v58 = vpop.f32.mrb[4].mxu0  ;;  %v1308_v59 = vpop.f32.mrb[4].mxu1 }
 0x157   : > { %v1159_v60 = vpack.c.bf16 %v717_v52, %v716_v50  ;;  %v1199_v61 = vpack.c.bf16 %v733_v53, %v732_v51  ;;  %v649_v62 = vmul.f32 %v1292_v58, %v1805_v24  ;;  %v665_v63 = vmul.f32 %v1308_v59, %v1805_v24  ;;  %v525_v0 = vpop.f32.mrb[5].mxu0  ;;  %v589_v1 = vpop.f32.mrb[5].mxu1 }
 0x158   : > { %v1154_v2 = vpack.c.bf16 %v715_v56, %v714_v54  ;;  %v1194_v3 = vpack.c.bf16 %v731_v57, %v730_v55  ;;  %v647_v4 = vmul.f32 %v1805_v24, %v525_v0  ;;  %v663_v5 = vmul.f32 %v1805_v24, %v589_v1  ;;  %v1293_v6 = vpop.f32.mrb[6].mxu0  ;;  %v1309_v7 = vpop.f32.mrb[6].mxu1 }
 0x159   : > { %1231 = vst [vmem:[%s1834_s21 + $0x8] sm:$0xff] %v1159_v60   ;;  %1239 = vst [vmem:[%s1834_s21 + $0x48] sm:$0xff] %v1199_v61   ;;  %v688_v8 = vadd.f32 %v1810_v26, %v649_v62  ;;  %v704_v9 = vadd.f32 %v1810_v26, %v665_v63  ;;  %v650_v10 = vmul.f32 %v1293_v6, %v1805_v24  ;;  %v528_v12 = vpop.f32.mrb[7].mxu0  ;;  %v592_v13 = vpop.f32.mrb[7].mxu1 }
 0x15a   : > { %v666_v11 = vmul.f32 %v1309_v7, %v1805_v24  ;;  %1155 = vst [vmem:[%s1834_s21] sm:$0xff] %v1154_v2   ;;  %1238 = vst [vmem:[%s1834_s21 + $0x40] sm:$0xff] %v1194_v3   ;;  %v686_v14 = vadd.f32 %v1810_v26, %v647_v4  ;;  %v702_v15 = vadd.f32 %v1810_v26, %v663_v5 }
 0x15b   : > { %v648_v16 = vmul.f32 %v1805_v24, %v528_v12  ;;  %v664_v17 = vmul.f32 %v1805_v24, %v592_v13  ;;  %v689_v18 = vadd.f32 %v1810_v26, %v650_v10  ;;  %v720_v22 = vmax.f32 %v688_v8, 0.0 }
 0x15c   : > { %v705_v19 = vadd.f32 %v1810_v26, %v666_v11  ;;  %v736_v23 = vmax.f32 %v704_v9, 0.0  ;;  %v718_v28 = vmax.f32 %v686_v14, 0.0  ;;  %v734_v29 = vmax.f32 %v702_v15, 0.0 }
 0x15d   : > { %v687_v20 = vadd.f32 %v1810_v26, %v648_v16  ;;  %v703_v21 = vadd.f32 %v1810_v26, %v664_v17  ;;  %v721_v25 = vmax.f32 %v689_v18, 0.0 }
 0x15e   : > { %v737_v27 = vmax.f32 %v705_v19, 0.0  ;;  %v1296_v32 = vpop.f32.mrb[8].mxu0  ;;  %v1312_v33 = vpop.f32.mrb[8].mxu1 }
 0x15f   : > { %v719_v30 = vmax.f32 %v687_v20, 0.0  ;;  %v735_v31 = vmax.f32 %v703_v21, 0.0  ;;  %v1169_v34 = vpack.c.bf16 %v721_v25, %v720_v22  ;;  %v653_v36 = vmul.f32 %v1296_v32, %v1805_v24  ;;  %v541_v38 = vpop.f32.mrb[9].mxu0  ;;  %v605_v39 = vpop.f32.mrb[9].mxu1 }
 0x160   : > { %v1209_v35 = vpack.c.bf16 %v737_v27, %v736_v23  ;;  %v669_v37 = vmul.f32 %v1312_v33, %v1805_v24  ;;  %v651_v42 = vmul.f32 %v1805_v24, %v541_v38  ;;  %v667_v43 = vmul.f32 %v1805_v24, %v605_v39  ;;  %v1297_v44 = vpop.f32.mrb[10].mxu0  ;;  %v1313_v45 = vpop.f32.mrb[10].mxu1 }
 0x161   : > { %v1164_v40 = vpack.c.bf16 %v719_v30, %v718_v28  ;;  %v1204_v41 = vpack.c.bf16 %v735_v31, %v734_v29  ;;  %1233 = vst [vmem:[%s1834_s21 + $0x18] sm:$0xff] %v1169_v34   ;;  %v692_v46 = vadd.f32 %v1810_v26, %v653_v36  ;;  %v654_v48 = vmul.f32 %v1297_v44, %v1805_v24  ;;  %v544_v50 = vpop.f32.mrb[11].mxu0  ;;  %v608_v51 = vpop.f32.mrb[11].mxu1 }
 0x162   : > { %1241 = vst [vmem:[%s1834_s21 + $0x58] sm:$0xff] %v1209_v35   ;;  %v708_v47 = vadd.f32 %v1810_v26, %v669_v37  ;;  %v670_v49 = vmul.f32 %v1313_v45, %v1805_v24  ;;  %v690_v52 = vadd.f32 %v1810_v26, %v651_v42  ;;  %v706_v53 = vadd.f32 %v1810_v26, %v667_v43 }
 0x163   : > { %1232 = vst [vmem:[%s1834_s21 + $0x10] sm:$0xff] %v1164_v40   ;;  %1240 = vst [vmem:[%s1834_s21 + $0x50] sm:$0xff] %v1204_v41   ;;  %v652_v54 = vmul.f32 %v1805_v24, %v544_v50  ;;  %v668_v55 = vmul.f32 %v1805_v24, %v608_v51  ;;  %v693_v56 = vadd.f32 %v1810_v26, %v654_v48  ;;  %v724_v60 = vmax.f32 %v692_v46, 0.0 }
 0x164   : > { %v709_v57 = vadd.f32 %v1810_v26, %v670_v49  ;;  %v740_v61 = vmax.f32 %v708_v47, 0.0  ;;  %v722_v0 = vmax.f32 %v690_v52, 0.0  ;;  %v738_v1 = vmax.f32 %v706_v53, 0.0 }
 0x165   : > { %v691_v58 = vadd.f32 %v1810_v26, %v652_v54  ;;  %v707_v59 = vadd.f32 %v1810_v26, %v668_v55  ;;  %v725_v62 = vmax.f32 %v693_v56, 0.0 }
 0x166   : > { %v741_v63 = vmax.f32 %v709_v57, 0.0  ;;  %v1300_v4 = vpop.f32.mrb[12].mxu0  ;;  %v1316_v5 = vpop.f32.mrb[12].mxu1 }
 0x167   : > { %v723_v2 = vmax.f32 %v691_v58, 0.0  ;;  %v739_v3 = vmax.f32 %v707_v59, 0.0  ;;  %v1179_v6 = vpack.c.bf16 %v725_v62, %v724_v60  ;;  %v657_v8 = vmul.f32 %v1300_v4, %v1805_v24  ;;  %v557_v10 = vpop.f32.mrb[13].mxu0  ;;  %v621_v11 = vpop.f32.mrb[13].mxu1 }
 0x168   : > { %v1219_v7 = vpack.c.bf16 %v741_v63, %v740_v61  ;;  %v673_v9 = vmul.f32 %v1316_v5, %v1805_v24  ;;  %v655_v14 = vmul.f32 %v1805_v24, %v557_v10  ;;  %v671_v15 = vmul.f32 %v1805_v24, %v621_v11  ;;  %v1301_v16 = vpop.f32.mrb[14].mxu0  ;;  %v1317_v17 = vpop.f32.mrb[14].mxu1 }
 0x169   : > { %v1174_v12 = vpack.c.bf16 %v723_v2, %v722_v0  ;;  %v1214_v13 = vpack.c.bf16 %v739_v3, %v738_v1  ;;  %1235 = vst [vmem:[%s1834_s21 + $0x28] sm:$0xff] %v1179_v6   ;;  %v696_v18 = vadd.f32 %v1810_v26, %v657_v8  ;;  %v658_v20 = vmul.f32 %v1301_v16, %v1805_v24  ;;  %v560_v22 = vpop.f32.mrb[15].mxu0  ;;  %v624_v23 = vpop.f32.mrb[15].mxu1 }
 0x16a   : > { %1243 = vst [vmem:[%s1834_s21 + $0x68] sm:$0xff] %v1219_v7   ;;  %v712_v19 = vadd.f32 %v1810_v26, %v673_v9  ;;  %v674_v21 = vmul.f32 %v1317_v17, %v1805_v24  ;;  %v694_v25 = vadd.f32 %v1810_v26, %v655_v14  ;;  %v710_v27 = vadd.f32 %v1810_v26, %v671_v15 }
 0x16b   : > { %1234 = vst [vmem:[%s1834_s21 + $0x20] sm:$0xff] %v1174_v12   ;;  %1242 = vst [vmem:[%s1834_s21 + $0x60] sm:$0xff] %v1214_v13   ;;  %v656_v28 = vmul.f32 %v1805_v24, %v560_v22  ;;  %v672_v29 = vmul.f32 %v1805_v24, %v624_v23  ;;  %v697_v30 = vadd.f32 %v1810_v26, %v658_v20  ;;  %v728_v34 = vmax.f32 %v696_v18, 0.0 }
 0x16c   : > { %v713_v31 = vadd.f32 %v1810_v26, %v674_v21  ;;  %v744_v35 = vmax.f32 %v712_v19, 0.0  ;;  %v726_v24 = vmax.f32 %v694_v25, 0.0  ;;  %v742_v38 = vmax.f32 %v710_v27, 0.0 }
 0x16d   : > { %v695_v32 = vadd.f32 %v1810_v26, %v656_v28  ;;  %v711_v33 = vadd.f32 %v1810_v26, %v672_v29  ;;  %v729_v36 = vmax.f32 %v697_v30, 0.0 }
 0x16e   : > { %v745_v37 = vmax.f32 %v713_v31, 0.0 }
 0x16f   : > { %v727_v39 = vmax.f32 %v695_v32, 0.0  ;;  %v743_v40 = vmax.f32 %v711_v33, 0.0  ;;  %v1189_v41 = vpack.c.bf16 %v729_v36, %v728_v34 }
 0x170   : > { %v1229_v42 = vpack.c.bf16 %v745_v37, %v744_v35 }
 0x171   : > { %v1184_v26 = vpack.c.bf16 %v727_v39, %v726_v24  ;;  %v1224_v43 = vpack.c.bf16 %v743_v40, %v742_v38  ;;  %1237 = vst [vmem:[%s1834_s21 + $0x38] sm:$0xff] %v1189_v41  }
 0x172   : > { %1245 = vst [vmem:[%s1834_s21 + $0x78] sm:$0xff] %v1229_v42  }
 0x173   : > { %1236 = vst [vmem:[%s1834_s21 + $0x30] sm:$0xff] %v1184_v26   ;;  %1244 = vst [vmem:[%s1834_s21 + $0x70] sm:$0xff] %v1224_v43  }
 0x174   : > { %1506 = shalt.err (!%p1503_p5)
}
 0x175   : > { %s1507_s8 = scalar_lea.hbm %s1897_s18, 2048  ;;  %s1511_s27 = scalar_lea.hbm %s1955_s4, 8192 }
 0x176   : > { %p1508_p9 = scmp.ne.s32.totalorder %s1897_s18, %s1507_s8  ;;  %p1512_p3 = scmp.lt.u32.totalorder %s1897_s18, %s1955_s4 }
 0x177   : > { %p1513_p7 = scmp.lt.u32.totalorder %s1511_s27, %s1507_s8  ;;  %p1515_p4 = scmp.lt.u32.totalorder %s1507_s8, %s1897_s18 }
 0x178   : > { %p1509_p1 = pnand %p1508_p9, %p1711_p11 }
 0x179   : > { %p1514_p13 = por %p1513_p7, %p1512_p3 }
 0x17a   : > { %p1510_p2 = pneg %p1509_p1 }
 0x17b   : > { %p1516_p6 = por %p1515_p4, %p1514_p13 }
 0x17d   : > { %p1517_p8 = pnand %p1516_p6, %p1510_p2 }
 0x17f   : > { %1520 = shalt.err (!%p1517_p8)
}
 0x180   : > { %s1586_s22 = smov 64   ;;  %s1587_s6 = smov 4  }
 0x181   : > { %1340 = dma.vmem_to_hbm [thread:$0]  (%p1711_p11), %s1899_s28, 2048, %s1897_s18, %s907_s9, %s1586_s22, %s1586_s22, %s1587_s6  }
 0x182 PF: > { %p1357_p12 = scmp.ge.s32.totalorder %s1579_s20, 2  ;;  %s936_s29 = sand.u32 1, %s1559_s15  }
 0x183   : > { %p1973_p10 = scmp.ne.s32.totalorder %s1963_s26, 0  ;;  %s937_s11 = scalar_lea.sflag [#allocation4], %s936_s29 }
 0x185   : > { %p1351_p0 = pnand %p1357_p12, %p1973_p10 }
 0x187   : > { %1554 = dma.done.wait (!%p1351_p0), %s937_s11, 2048  }
 0x188   : > { %1556 = vsyncadd (!%p1351_p0), %s937_s11, 4294965248  ;;  %s21_s20 = sadd.s32 1, %s1579_s20   ;;  %s1974_s15 = smov %s1563_s16 }
 0x189   : > { %p18_p5 = scmp.ge.s32.totalorder %s21_s20, 6   ;;  %s1975_s16 = smov %s1567_s17 }
 0x18a   : > { %s1976_s17 = smov %s1720_s10  ;;  %s1977_s18 = smov %s1575_s19 }
 0x18b   : > { %s1978_s19 = smov %s1980_s5  ;;  %20 = sbr.rel (!%p18_p5) target bundleno = 7 (0x7), region = 92 }
 0x192   :  { %942 = vsyncpa [#allocation3], 1 }
 0x193   :  { %944 = vsyncpa [#allocation3 + $0x1], 1 }
 0x194   :  { %945 = vsyncpa [#allocation6], 1 }
 0x195   :  { %946 = vsyncpa [#allocation4], 1 }
 0x196   :  { %948 = vsyncpa [#allocation4 + $0x1], 1 }

</bundles_post_ra>
